<compile_context>
chip_gen: v7x
topology: tpu7x:2x2x1
jax: 0.10.0
libtpu: 0.0.40
codegen_flags: <defaults>
</compile_context>

<pallas_src>
import jax
import jax.numpy as jnp
from jax.experimental import pallas as pl
from jax.experimental.pallas import tpu as pltpu

BN_EPS = 1e-5       # PyTorch BatchNorm1d default eps
LANES = 128         # TPU lane width


def _round_up(x, m):
    return ((x + m - 1) // m) * m


def _make_kernel(batch, fc1, fc2, na_pad):
    """Build the DQN forward kernel for static layer sizes."""
    inv_b = 1.0 / float(batch)

    def _bn_train(h, gamma, beta):
        # One-pass training-mode BatchNorm1d: biased batch variance, fused scale/shift.
        s = jnp.sum(h, axis=0, keepdims=True)
        s2 = jnp.sum(h * h, axis=0, keepdims=True)
        mean = s * inv_b
        var = s2 * inv_b - mean * mean
        scale = gamma * jax.lax.rsqrt(var + BN_EPS)
        shift = beta - mean * scale
        return h * scale + shift

    def kernel(x_ref, w1_ref, w2_ref, w3_ref, vec_ref, out_ref):
        x = x_ref[...]            # [B, in]  f32
        vec = vec_ref[...]        # [8, vec_cols] f32  (packed b/gamma/beta rows)

        # fc1 -> relu -> bn1
        h1 = jnp.dot(x.astype(jnp.bfloat16), w1_ref[...],
                     preferred_element_type=jnp.float32) + vec[0:1, :fc1]
        h1 = jnp.maximum(h1, 0.0)
        h1 = _bn_train(h1, vec[1:2, :fc1], vec[2:3, :fc1])

        # fc2 -> relu -> bn2
        h2 = jnp.dot(h1.astype(jnp.bfloat16), w2_ref[...],
                     preferred_element_type=jnp.float32) + vec[3:4, :fc2]
        h2 = jnp.maximum(h2, 0.0)
        h2 = _bn_train(h2, vec[4:5, :fc2], vec[5:6, :fc2])

        # fc3 (no activation); output already padded to a lane-dense width.
        out = jnp.dot(h2.astype(jnp.bfloat16), w3_ref[...],
                      preferred_element_type=jnp.float32) + vec[6:7, :na_pad]
        out_ref[...] = out.astype(out_ref.dtype)

    return kernel


def deep_q_network_forward(state, params):
    """state: [B, input_dims] float32; params: dict of kernel-layout weights."""
    B = state.shape[0]
    fc1 = params["w1"].shape[1]
    fc2 = params["w2"].shape[1]
    na = params["w3"].shape[1]
    na_pad = max(LANES, _round_up(na, LANES))       # lane-dense output width
    vec_cols = max(fc1, fc2, na_pad)

    # Pre-cast matmul weights to bf16 (halves weight DMA bytes, full-rate MXU on v6e/v7x).
    w1 = params["w1"].astype(jnp.bfloat16)
    w2 = params["w2"].astype(jnp.bfloat16)
    w3 = jnp.zeros((fc2, na_pad), jnp.bfloat16).at[:, :na].set(
        params["w3"].astype(jnp.bfloat16))

    # Pack all tiny per-layer vectors into one [8, vec_cols] f32 slab (one VMEM tile).
    # rows: 0=b1 1=g1 2=be1 3=b2 4=g2 5=be2 6=b3(padded) 7=unused
    vecs = jnp.zeros((8, vec_cols), jnp.float32)
    vecs = vecs.at[0, :fc1].set(params["b1"].reshape(-1))
    vecs = vecs.at[1, :fc1].set(params["g1"].reshape(-1))
    vecs = vecs.at[2, :fc1].set(params["be1"].reshape(-1))
    vecs = vecs.at[3, :fc2].set(params["b2"].reshape(-1))
    vecs = vecs.at[4, :fc2].set(params["g2"].reshape(-1))
    vecs = vecs.at[5, :fc2].set(params["be2"].reshape(-1))
    vecs = vecs.at[6, :na].set(params["b3"].reshape(-1))

    kernel = _make_kernel(B, fc1, fc2, na_pad)
    vmem_spec = pl.BlockSpec(memory_space=pltpu.MemorySpace.VMEM)

    out_padded = pl.pallas_call(
        kernel,
        out_shape=jax.ShapeDtypeStruct((B, na_pad), jnp.float32),
        in_specs=[vmem_spec] * 5,
        out_specs=vmem_spec,
    )(state, w1, w2, w3, vecs)

    return out_padded[:, :na]


def init_params(key, input_dims, fc1_dims, fc2_dims, n_actions):
    """Deterministic synthetic init (PyTorch-Linear-like uniform ranges), f32 master copy."""
    ks = jax.random.split(key, 6)

    def linear(kw, kb, fan_in, fan_out):
        bound = 1.0 / jnp.sqrt(fan_in)
        # stored already transposed: [in, out]
        w = jax.random.uniform(kw, (fan_in, fan_out), jnp.float32, -bound, bound)
        b = jax.random.uniform(kb, (1, fan_out), jnp.float32, -bound, bound)
        return w, b

    w1, b1 = linear(ks[0], ks[1], input_dims, fc1_dims)
    w2, b2 = linear(ks[2], ks[3], fc1_dims, fc2_dims)
    w3, b3 = linear(ks[4], ks[5], fc2_dims, n_actions)

    return {
        "w1": w1, "b1": b1,
        "g1": jnp.ones((1, fc1_dims), jnp.float32),
        "be1": jnp.zeros((1, fc1_dims), jnp.float32),
        "w2": w2, "b2": b2,
        "g2": jnp.ones((1, fc2_dims), jnp.float32),
        "be2": jnp.zeros((1, fc2_dims), jnp.float32),
        "w3": w3, "b3": b3,
    }


def reference_forward(state, p):
    """Pure-f32 reference with the original module's semantics (training-mode BN)."""
    h1 = jnp.maximum(state @ p["w1"] + p["b1"], 0.0)
    m, v = jnp.mean(h1, 0, keepdims=True), jnp.var(h1, 0, keepdims=True)
    h1 = (h1 - m) / jnp.sqrt(v + BN_EPS) * p["g1"] + p["be1"]
    h2 = jnp.maximum(h1 @ p["w2"] + p["b2"], 0.0)
    m, v = jnp.mean(h2, 0, keepdims=True), jnp.var(h2, 0, keepdims=True)
    h2 = (h2 - m) / jnp.sqrt(v + BN_EPS) * p["g2"] + p["be2"]
    return h2 @ p["w3"] + p["b3"]


if __name__ == "__main__":
    # Small shapes consistent with the module: input_dims=(32,), fc1=64, fc2=32, n_actions=8
    B, IN, FC1, FC2, NA = 8, 32, 64, 32, 8

    key = jax.random.PRNGKey(0)
    k_state, k_params = jax.random.split(key)

    state = jax.random.normal(k_state, (B, IN), jnp.float32)
    params = init_params(k_params, IN, FC1, FC2, NA)

    out = deep_q_network_forward(state, params)
    out = jax.block_until_ready(out)

    ref = reference_forward(state, params)
    assert out.shape == (B, NA)
    # Tolerance sized for bf16 MXU inputs (f32 accumulation); BN math is f32.
    assert jnp.allclose(out, ref, atol=5e-2, rtol=5e-2), "mismatch vs reference"

    print("KERNEL_OK")
</pallas_src>

<mosaic_0001>
module attributes {stable_mosaic.version = 11 : i64} {
  func.func @kernel(%arg0: memref<8x32xf32, #tpu.memory_space<vmem>>, %arg1: memref<32x64xbf16, #tpu.memory_space<vmem>>, %arg2: memref<64x32xbf16, #tpu.memory_space<vmem>>, %arg3: memref<32x128xbf16, #tpu.memory_space<vmem>>, %arg4: memref<8x128xf32, #tpu.memory_space<vmem>>, %arg5: memref<8x128xf32, #tpu.memory_space<vmem>>) attributes {dimension_semantics = [], scalar_prefetch = 0 : i64, scratch_operands = 0 : i64, tpu.core_type = #tpu.core_type<tc>} {
    %c0 = arith.constant 0 : index
    %c0_0 = arith.constant 0 : index
    %0 = vector.load %arg0[%c0, %c0_0] : memref<8x32xf32, #tpu.memory_space<vmem>>, vector<8x32xf32>
    %c0_1 = arith.constant 0 : index
    %c0_2 = arith.constant 0 : index
    %1 = vector.load %arg4[%c0_1, %c0_2] : memref<8x128xf32, #tpu.memory_space<vmem>>, vector<8x128xf32>
    %2 = arith.truncf %0 : vector<8x32xf32> to vector<8x32xbf16>
    %c0_3 = arith.constant 0 : index
    %c0_4 = arith.constant 0 : index
    %3 = vector.load %arg1[%c0_3, %c0_4] : memref<32x64xbf16, #tpu.memory_space<vmem>>, vector<32x64xbf16>
    %cst = arith.constant dense<0.000000e+00> : vector<8x64xf32>
    %4 = tpu.matmul %2, %3, %cst {dimension_numbers = #tpu.dot_dimension_numbers<[1], [0], [0], [1], [0, 0, 1, 1], [], []>} : vector<8x32xbf16>, vector<32x64xbf16>, vector<8x64xf32> -> vector<8x64xf32>
    %5 = vector.extract_strided_slice %1 {offsets = [0, 0], sizes = [1, 64], strides = [1, 1]} : vector<8x128xf32> to vector<1x64xf32>
    %6 = vector.broadcast %5 : vector<1x64xf32> to vector<8x64xf32>
    %7 = arith.addf %4, %6 : vector<8x64xf32>
    %cst_5 = arith.constant 0.000000e+00 : f32
    %8 = vector.broadcast %cst_5 : f32 to vector<8x64xf32>
    %9 = arith.maximumf %7, %8 : vector<8x64xf32>
    %10 = vector.extract_strided_slice %1 {offsets = [1, 0], sizes = [1, 64], strides = [1, 1]} : vector<8x128xf32> to vector<1x64xf32>
    %11 = vector.extract_strided_slice %1 {offsets = [2, 0], sizes = [1, 64], strides = [1, 1]} : vector<8x128xf32> to vector<1x64xf32>
    %cst_6 = arith.constant dense<0.000000e+00> : vector<64xf32>
    %12 = vector.multi_reduction <add>, %9, %cst_6 [0] : vector<8x64xf32> to vector<64xf32>
    %13 = vector.shape_cast %12 : vector<64xf32> to vector<1x64xf32>
    %14 = arith.mulf %9, %9 : vector<8x64xf32>
    %cst_7 = arith.constant dense<0.000000e+00> : vector<64xf32>
    %15 = vector.multi_reduction <add>, %14, %cst_7 [0] : vector<8x64xf32> to vector<64xf32>
    %16 = vector.shape_cast %15 : vector<64xf32> to vector<1x64xf32>
    %cst_8 = arith.constant 1.250000e-01 : f32
    %17 = vector.broadcast %cst_8 : f32 to vector<1x64xf32>
    %18 = arith.mulf %13, %17 : vector<1x64xf32>
    %cst_9 = arith.constant 1.250000e-01 : f32
    %19 = vector.broadcast %cst_9 : f32 to vector<1x64xf32>
    %20 = arith.mulf %16, %19 : vector<1x64xf32>
    %21 = arith.mulf %18, %18 : vector<1x64xf32>
    %22 = arith.subf %20, %21 : vector<1x64xf32>
    %cst_10 = arith.constant 9.99999974E-6 : f32
    %23 = vector.broadcast %cst_10 : f32 to vector<1x64xf32>
    %24 = arith.addf %22, %23 : vector<1x64xf32>
    %25 = math.rsqrt %24 : vector<1x64xf32>
    %26 = arith.mulf %10, %25 : vector<1x64xf32>
    %27 = arith.mulf %18, %26 : vector<1x64xf32>
    %28 = arith.subf %11, %27 : vector<1x64xf32>
    %29 = vector.broadcast %26 : vector<1x64xf32> to vector<8x64xf32>
    %30 = arith.mulf %9, %29 : vector<8x64xf32>
    %31 = vector.broadcast %28 : vector<1x64xf32> to vector<8x64xf32>
    %32 = arith.addf %30, %31 : vector<8x64xf32>
    %33 = arith.truncf %32 : vector<8x64xf32> to vector<8x64xbf16>
    %c0_11 = arith.constant 0 : index
    %c0_12 = arith.constant 0 : index
    %34 = vector.load %arg2[%c0_11, %c0_12] : memref<64x32xbf16, #tpu.memory_space<vmem>>, vector<64x32xbf16>
    %cst_13 = arith.constant dense<0.000000e+00> : vector<8x32xf32>
    %35 = tpu.matmul %33, %34, %cst_13 {dimension_numbers = #tpu.dot_dimension_numbers<[1], [0], [0], [1], [0, 0, 1, 1], [], []>} : vector<8x64xbf16>, vector<64x32xbf16>, vector<8x32xf32> -> vector<8x32xf32>
    %36 = vector.extract_strided_slice %1 {offsets = [3, 0], sizes = [1, 32], strides = [1, 1]} : vector<8x128xf32> to vector<1x32xf32>
    %37 = vector.broadcast %36 : vector<1x32xf32> to vector<8x32xf32>
    %38 = arith.addf %35, %37 : vector<8x32xf32>
    %cst_14 = arith.constant 0.000000e+00 : f32
    %39 = vector.broadcast %cst_14 : f32 to vector<8x32xf32>
    %40 = arith.maximumf %38, %39 : vector<8x32xf32>
    %41 = vector.extract_strided_slice %1 {offsets = [4, 0], sizes = [1, 32], strides = [1, 1]} : vector<8x128xf32> to vector<1x32xf32>
    %42 = vector.extract_strided_slice %1 {offsets = [5, 0], sizes = [1, 32], strides = [1, 1]} : vector<8x128xf32> to vector<1x32xf32>
    %cst_15 = arith.constant dense<0.000000e+00> : vector<32xf32>
    %43 = vector.multi_reduction <add>, %40, %cst_15 [0] : vector<8x32xf32> to vector<32xf32>
    %44 = vector.shape_cast %43 : vector<32xf32> to vector<1x32xf32>
    %45 = arith.mulf %40, %40 : vector<8x32xf32>
    %cst_16 = arith.constant dense<0.000000e+00> : vector<32xf32>
    %46 = vector.multi_reduction <add>, %45, %cst_16 [0] : vector<8x32xf32> to vector<32xf32>
    %47 = vector.shape_cast %46 : vector<32xf32> to vector<1x32xf32>
    %cst_17 = arith.constant 1.250000e-01 : f32
    %48 = vector.broadcast %cst_17 : f32 to vector<1x32xf32>
    %49 = arith.mulf %44, %48 : vector<1x32xf32>
    %cst_18 = arith.constant 1.250000e-01 : f32
    %50 = vector.broadcast %cst_18 : f32 to vector<1x32xf32>
    %51 = arith.mulf %47, %50 : vector<1x32xf32>
    %52 = arith.mulf %49, %49 : vector<1x32xf32>
    %53 = arith.subf %51, %52 : vector<1x32xf32>
    %cst_19 = arith.constant 9.99999974E-6 : f32
    %54 = vector.broadcast %cst_19 : f32 to vector<1x32xf32>
    %55 = arith.addf %53, %54 : vector<1x32xf32>
    %56 = math.rsqrt %55 : vector<1x32xf32>
    %57 = arith.mulf %41, %56 : vector<1x32xf32>
    %58 = arith.mulf %49, %57 : vector<1x32xf32>
    %59 = arith.subf %42, %58 : vector<1x32xf32>
    %60 = vector.broadcast %57 : vector<1x32xf32> to vector<8x32xf32>
    %61 = arith.mulf %40, %60 : vector<8x32xf32>
    %62 = vector.broadcast %59 : vector<1x32xf32> to vector<8x32xf32>
    %63 = arith.addf %61, %62 : vector<8x32xf32>
    %64 = arith.truncf %63 : vector<8x32xf32> to vector<8x32xbf16>
    %c0_20 = arith.constant 0 : index
    %c0_21 = arith.constant 0 : index
    %65 = vector.load %arg3[%c0_20, %c0_21] : memref<32x128xbf16, #tpu.memory_space<vmem>>, vector<32x128xbf16>
    %cst_22 = arith.constant dense<0.000000e+00> : vector<8x128xf32>
    %66 = tpu.matmul %64, %65, %cst_22 {dimension_numbers = #tpu.dot_dimension_numbers<[1], [0], [0], [1], [0, 0, 1, 1], [], []>} : vector<8x32xbf16>, vector<32x128xbf16>, vector<8x128xf32> -> vector<8x128xf32>
    %67 = vector.extract_strided_slice %1 {offsets = [6, 0], sizes = [1, 128], strides = [1, 1]} : vector<8x128xf32> to vector<1x128xf32>
    %68 = vector.broadcast %67 : vector<1x128xf32> to vector<8x128xf32>
    %69 = arith.addf %66, %68 : vector<8x128xf32>
    %c0_23 = arith.constant 0 : index
    %c0_24 = arith.constant 0 : index
    %70 = vector.load %arg5[%c0_23, %c0_24] : memref<8x128xf32, #tpu.memory_space<vmem>>, vector<8x128xf32>
    tpu.vector_store %arg5[%c0_23, %c0_24], %69 {strides = array<i32>} : memref<8x128xf32, #tpu.memory_space<vmem>>, vector<8x128xf32>,
    return
  }
}

</mosaic_0001>

<bundles_post_ra>
// kernel: tpu_custom_call.1
= control target key start
LH: loop header
LB: loop body
LE: loop exit
PB: predicated region body
PF: predicated region fallthrough
CT: control target
= control target key end

     0   :  { %v414_v1 = vmov 0.0   ;;  %vm415_vm0 = vmmov 0   ;;  %vm45_vm1 = vcmask 261120   ;;  %s525_s0 = inlined_call_operand.vmem [shape: f32[8,32], index: 0, kind: input, shape index: {}]   ;;  %s526_s1 = inlined_call_operand.vmem [shape: bf16[32,64], index: 1, kind: input, shape index: {}]   ;;  %s527_s2 = inlined_call_operand.vmem [shape: bf16[64,32], index: 2, kind: input, shape index: {}]   ;;  %s528_s3 = inlined_call_operand.vmem [shape: bf16[32,128], index: 3, kind: input, shape index: {}]   ;;  %s529_s4 = inlined_call_operand.vmem [shape: f32[8,128], index: 4, kind: input, shape index: {}]   ;;  %s530_s5 = inlined_call_operand.hbm [shape: f32[8,128], index: 5, kind: output, shape index: {}]  }
   0x1   :  { %v378_v0 = vld [vmem:[%s526_s1] sm:$0xff]   ;;  %347 = vmatprep.subr.bf16.mxu0 %v414_v1  ;;  %355 = vmatprep.subr.bf16.mxu1 %v414_v1  ;;  %v379_v2 = vld [vmem:[%s526_s1 + $0x8] sm:$0xff]  }
   0x2   :  { %348 = vmatpush3.bf16.msra.mxu0 %v378_v0  ;;  %351 = vmatprep.mubr.msk.bf16.mxu0 %vm415_vm0, %v414_v1  ;;  %v22_v3 = vld [vmem:[%s525_s0] sm:$0xff] }
   0x3   :  { %349 = vmatprep.subr.bf16.mxu0 %v414_v1  ;;  %363 = vmatprep.mubr.msk.bf16.mxu1 %vm415_vm0, %v414_v1  ;;  %v24_v4 = vpack.c.bf16 %v22_v3, %v22_v3 }
   0x6   :  { %350 = vmatpush3.bf16.msra.mxu0 %v379_v2 }
   0x7   :  { %367 = vmatprep.subr.bf16.mxu0 %v414_v1 }
   0x8   :  { %10 = vsyncpa [#allocation3], 0  ;;  %v380_v5 = vld [vmem:[%s527_s2] sm:$0xff]   ;;  %v381_v6 = vld [vmem:[%s527_s2 + $0x8] sm:$0xff]   ;;  %v29_v9 = vlaneseq  ;;  %vm90_vm2 = vcmask 523264  }
   0x9   :  { %352 = vmatmul.mubr.msk.bf16.vlgmr.msra.gmra.mrb[0].mxu0 %vm45_vm1, %v24_v4  ;;  %356 = vmatpush3.bf16.msra.mxu1 %v380_v5  ;;  %v382_v7 = vld [vmem:[%s527_s2 + $0x10] sm:$0xff]   ;;  %v383_v8 = vld [vmem:[%s527_s2 + $0x18] sm:$0xff]   ;;  %v485_v12 = vld [vmem:[%s529_s4] sm:$0xff] }
   0xa   :  { %371 = vmatprep.mubr.msk.bf16.mxu0 %vm415_vm0, %v414_v1  ;;  %357 = vmatprep.subr.bf16.mxu1 %v414_v1  ;;  %v479_v10 = vshrl.u32 %v29_v9, 7  ;;  %v384_v52 = vld [vmem:[%s528_s3] sm:$0xff]   ;;  %v385_v53 = vld [vmem:[%s528_s3 + $0x8] sm:$0xff]   ;;  %s416_s3 = smov [#allocation2]  }
   0xb   :  { %368 = vmatpush3.bf16.msra.mxu0 %v384_v52  ;;  %s317_s9 = sshll.u32 %s416_s3, 4  ;;  %s318_s9 = int_to_ptr.vmem [resolvable:$true] %s317_s9 }
   0xc   :  { %v31_v11 = vsub.s32 0, %v479_v10  ;;  %v120_v42 = vsub.s32 1, %v479_v10  ;;  %v125_v46 = vsub.s32 2, %v479_v10  ;;  %369 = vmatprep.subr.bf16.mxu0 %v414_v1  ;;  %v139_v54 = vsub.s32 3, %v479_v10  ;;  %s390_s10 = scalar_lea.vmem %s318_s9, 128  ;;  %p395_p1 = scmp.lt.s32.totalorder %s318_s9, %s318_s9 }
   0xd   :  { %358 = vmatpush3.bf16.msra.mxu1 %v381_v6  ;;  %p391_p0 = scmp.ne.s32.totalorder %s318_s9, %s390_s10  ;;  %p396_p2 = scmp.lt.s32.totalorder %s390_s10, %s390_s10 }
   0xe   :  { %359 = vmatprep.subr.bf16.mxu1 %v414_v1  ;;  %v32_v13 = vrot.slane %v485_v12, %v31_v11  ;;  %v140_v55 = vrot.slane %v485_v12, %v139_v54 }
   0xf   :  { %370 = vmatpush3.bf16.msra.mxu0 %v385_v53  ;;  %p397_p3 = por %p396_p2, %p395_p1 }
  0x11   :  { %360 = vmatpush3.bf16.msra.mxu1 %v382_v7  ;;  %p398_p4 = pnand %p397_p3, %p391_p0 }
  0x12   :  { %361 = vmatprep.subr.bf16.mxu1 %v414_v1 }
  0x15   :  { %362 = vmatpush3.bf16.msra.mxu1 %v383_v8 }
  0xdc   :  { %v83_v14 = vpop.f32.mrb[0].mxu0 }
  0xdd   :  { %v84_v15 = vadd.f32 %v83_v14, %v32_v13  ;;  %v353_v16 = vpop.f32.mrb[1].mxu0 }
  0xde   :  { %v86_v17 = vpop.f32.mrb[2].mxu0 }
  0xdf   :  { %v89_v18 = vmax.f32 %v84_v15, 0.0  ;;  %v354_v19 = vpop.f32.mrb[3].mxu0 }
  0xe1   :  { %v98_v20 = vmul.f32 %v89_v18, %v89_v18  ;;  %v91_v21 = vsel %vm90_vm2, %v89_v18, 0.0 }
  0xe2   :  { %v92_v22 = vrot.slane %v91_v21, 4 }
  0xe3   :  { %v99_v23 = vsel %vm90_vm2, %v98_v20, 0.0 }
  0xe4   :  { %v93_v24 = vadd.f32 %v92_v22, %v91_v21  ;;  %v100_v25 = vrot.slane %v99_v23, 4  ;;  %v238_v22 = vsub.s32 4, %v479_v10 }
  0xe6   :  { %v94_v26 = vrot.slane %v93_v24, 2  ;;  %v101_v27 = vadd.f32 %v100_v25, %v99_v23 }
  0xe8   :  { %v95_v28 = vadd.f32 %v94_v26, %v93_v24  ;;  %v102_v29 = vrot.slane %v101_v27, 2  ;;  %v243_v26 = vsub.s32 5, %v479_v10 }
  0xea   :  { %v96_v30 = vrot.slane %v95_v28, 1  ;;  %v103_v31 = vadd.f32 %v102_v29, %v101_v27 }
  0xec   :  { %v97_v32 = vadd.f32 %v96_v30, %v95_v28  ;;  %v104_v33 = vrot.slane %v103_v31, 1 }
  0xee   :  { %v105_v34 = vadd.f32 %v104_v33, %v103_v31  ;;  %v106_v35 = vmul.f32 0.125, %v97_v32  ;;  %v253_v32 = vsub.s32 6, %v479_v10 }
  0xf0   :  { %v107_v36 = vmul.f32 0.125, %v105_v34  ;;  %v108_v37 = vmul.f32 %v106_v35, %v106_v35  ;;  %v254_v33 = vrot.slane %v485_v12, %v253_v32 }
  0xf2   :  { %v109_v38 = vsub.f32 %v107_v36, %v108_v37 }
  0xf4   :  { %v110_v39 = vadd.f32 1e-05, %v109_v38 }
  0xf6   :  { %386 = vrsqrt.f32 %v110_v39 }
 0x100   :  { %v387_v40 = vpop.eup %386 }
 0x101   :  { %v112_v41 = vmul.f32 %v387_v40, %v485_v12 }
 0x103   :  { %v113_v43 = vmul.f32 %v112_v41, %v106_v35  ;;  %v121_v45 = vrot.slane %v112_v41, %v120_v42 }
 0x105   :  { %v115_v44 = vrot.slane %v113_v43, 7  ;;  %v122_v48 = vmul.f32 %v121_v45, %v89_v18 }
 0x107   :  { %v117_v47 = vsub.f32 %v485_v12, %v115_v44 }
 0x109   :  { %v126_v49 = vrot.slane %v117_v47, %v125_v46 }
 0x10b   :  { %v127_v50 = vadd.f32 %v126_v49, %v122_v48 }
 0x10d   :  { %v128_v51 = vpack.c.bf16 %v127_v50, %v127_v50 }
 0x10f   :  { %364 = vmatmul.mubr.msk.bf16.vlgmr.msra.gmra.mrb[0].mxu1 %vm90_vm2, %v128_v51 }
 0x1e2   :  { %v202_v56 = vpop.f32.mrb[0].mxu1 }
 0x1e3   :  { %v203_v57 = vadd.f32 %v202_v56, %v140_v55  ;;  %v365_v58 = vpop.f32.mrb[1].mxu1 }
 0x1e4   :  { %v205_v59 = vpop.f32.mrb[2].mxu1 }
 0x1e5   :  { %v208_v60 = vmax.f32 %v203_v57, 0.0  ;;  %v366_v61 = vpop.f32.mrb[3].mxu1 }
 0x1e7   :  { %v209_v62 = vsel %vm45_vm1, %v208_v60, 0.0  ;;  %v216_v63 = vmul.f32 %v208_v60, %v208_v60 }
 0x1e8   :  { %v210_v0 = vrot.slane %v209_v62, 4 }
 0x1e9   :  { %v217_v1 = vsel %vm45_vm1, %v216_v63, 0.0 }
 0x1ea   :  { %v211_v2 = vadd.f32 %v210_v0, %v209_v62  ;;  %v218_v3 = vrot.slane %v217_v1, 4 }
 0x1ec   :  { %v212_v4 = vrot.slane %v211_v2, 2  ;;  %v219_v5 = vadd.f32 %v218_v3, %v217_v1 }
 0x1ee   :  { %v213_v6 = vadd.f32 %v212_v4, %v211_v2  ;;  %v220_v7 = vrot.slane %v219_v5, 2 }
 0x1f0   :  { %v214_v8 = vrot.slane %v213_v6, 1  ;;  %v221_v9 = vadd.f32 %v220_v7, %v219_v5 }
 0x1f2   :  { %v215_v11 = vadd.f32 %v214_v8, %v213_v6  ;;  %v222_v13 = vrot.slane %v221_v9, 1 }
 0x1f4   :  { %v223_v14 = vadd.f32 %v222_v13, %v221_v9  ;;  %v224_v15 = vmul.f32 0.125, %v215_v11 }
 0x1f6   :  { %v225_v16 = vmul.f32 0.125, %v223_v14  ;;  %v226_v17 = vmul.f32 %v224_v15, %v224_v15 }
 0x1f8   :  { %v227_v18 = vsub.f32 %v225_v16, %v226_v17 }
 0x1fa   :  { %v228_v19 = vadd.f32 1e-05, %v227_v18 }
 0x1fc   :  { %388 = vrsqrt.f32 %v228_v19 }
 0x206   :  { %v389_v20 = vpop.eup %388 }
 0x207   :  { %v230_v21 = vmul.f32 %v389_v20, %v485_v12 }
 0x209   :  { %v231_v23 = vmul.f32 %v230_v21, %v224_v15  ;;  %v239_v25 = vrot.slane %v230_v21, %v238_v22 }
 0x20b   :  { %v233_v24 = vrot.slane %v231_v23, 7  ;;  %v240_v28 = vmul.f32 %v239_v25, %v208_v60 }
 0x20d   :  { %v235_v27 = vsub.f32 %v485_v12, %v233_v24 }
 0x20f   :  { %v244_v29 = vrot.slane %v235_v27, %v243_v26 }
 0x211   :  { %v245_v30 = vadd.f32 %v244_v29, %v240_v28 }
 0x213   :  { %v246_v31 = vpack.c.bf16 %v245_v30, %v245_v30 }
 0x215   :  { %372 = vmatmul.mubr.msk.bf16.vlgmr.msra.gmra.mrb[4].mxu0 %vm45_vm1, %v246_v31 }
 0x2e8   :  { %v304_v34 = vpop.f32.mrb[4].mxu0 }
 0x2e9   :  { %v305_v35 = vadd.f32 %v304_v34, %v254_v33  ;;  %v373_v36 = vpop.f32.mrb[5].mxu0 }
 0x2ea   :  { %v307_v37 = vpop.f32.mrb[6].mxu0 }
 0x2eb   :  { %310 = vst [vmem:[#allocation2] sm:$0xff] %v305_v35  ;;  %v374_v38 = vpop.f32.mrb[7].mxu0 }
 0x2ec   :  { %401 = shalt.err (!%p398_p4)
}
 0x2ed   :  { %s402_s13 = scalar_lea.hbm %s530_s5, 128 }
 0x2ee   :  { %p403_p5 = scmp.ne.s32.totalorder %s530_s5, %s402_s13  ;;  %p406_p6 = scmp.lt.u32.totalorder %s402_s13, %s530_s5 }
 0x2f0   :  { %p408_p7 = pnand %p406_p6, %p403_p5 }
 0x2f2   :  { %411 = shalt.err (!%p408_p7)
}
 0x2f3   :  { %320 = dma.vmem_to_hbm [thread:$0]  %s318_s9, 128, %s530_s5, [#allocation3]  }
 0x2f4   :  { %412 = dma.done.wait [#allocation3], 128  }
 0x2f5   :  { %413 = vsyncadd [#allocation3], 4294967168 }
 0x2f6   :  { %324 = vsyncpa [#allocation3], 1 }

</bundles_post_ra>
